<compile_context>
chip_gen: v6e
topology: v6e:2x2x1
jax: 0.10.0
libtpu: 0.0.40
codegen_flags: <defaults>
</compile_context>

<pallas_src>
import functools
import math

import jax
import jax.numpy as jnp
from jax.experimental import pallas as pl
from jax.experimental.pallas import tpu as pltpu


# -----------------------------------------------------------------------------
# Tiling helper: largest row tile whose double-buffered big streams fit a VMEM
# budget that is safe on every generation (v5e scoped default 16 MiB, v6e/v7x
# 32 MiB scoped / v7x 64 MiB physical).  Cap is dtype aware (f32 vs bf16).
# -----------------------------------------------------------------------------
_SUBLANE = 8


def _pick_tile_t(T, D, dtype, n_big_streams, budget_bytes=12 << 20):
    itemsize = jnp.dtype(dtype).itemsize
    per_row = max(1, n_big_streams * 2 * D * itemsize)        # x2 double-buffer
    tile = budget_bytes // per_row
    cap = 1024 if itemsize >= 4 else 2048                     # f32 / bf16 caps
    tile = min(tile, cap, T)
    if tile >= _SUBLANE:
        tile = (tile // _SUBLANE) * _SUBLANE
    else:
        tile = T
    return max(1, min(tile, T))


# -----------------------------------------------------------------------------
# Pallas kernel 1: fused LayerNorm (no affine, eps=1e-6) + AdaLN modulation
#   out = LayerNorm(x) * (1 + scale) + shift
# -----------------------------------------------------------------------------
def _ln_modulate_kernel(shift_ref, scale_ref, x_ref, o_ref, *, eps):
    x = x_ref[0].astype(jnp.float32)                       # (TILE_T, D)
    mean = jnp.mean(x, axis=-1, keepdims=True)
    xc = x - mean
    var = jnp.mean(xc * xc, axis=-1, keepdims=True)        # biased var (torch LN)
    xn = xc * jax.lax.rsqrt(var + eps)                     # rsqrt -> EUP slot
    scale = scale_ref[0].astype(jnp.float32)               # (1, D)
    shift = shift_ref[0].astype(jnp.float32)               # (1, D)
    o_ref[0] = (xn * (1.0 + scale) + shift).astype(o_ref.dtype)


def ln_modulate(x, shift, scale, *, eps=1e-6):
    """x: (B,T,D); shift/scale: (B,D) -> LayerNorm(x)*(1+scale)+shift."""
    B, T, D = x.shape
    tile_t = _pick_tile_t(T, D, x.dtype, n_big_streams=2)
    grid = (B, pl.cdiv(T, tile_t))
    vec_spec = pl.BlockSpec((1, 1, D), lambda b, t: (b, 0, 0))
    big_spec = pl.BlockSpec((1, tile_t, D), lambda b, t: (b, t, 0))
    itemsize = jnp.dtype(x.dtype).itemsize
    cost = pl.CostEstimate(flops=8 * B * T * D, transcendentals=B * T,
                           bytes_accessed=2 * B * T * D * itemsize + 2 * B * D * 4)
    return pl.pallas_call(
        functools.partial(_ln_modulate_kernel, eps=eps),
        out_shape=jax.ShapeDtypeStruct((B, T, D), x.dtype),
        grid_spec=pltpu.PrefetchScalarGridSpec(
            num_scalar_prefetch=0, grid=grid,
            in_specs=[vec_spec, vec_spec, big_spec],
            out_specs=big_spec),
        # NOTE: on v7x, verify both TensorCores are active in a trace; if not,
        # switch the T axis to pltpu.CORE_PARALLEL.
        compiler_params=pltpu.CompilerParams(
            dimension_semantics=("parallel", "parallel")),
        cost_estimate=cost,
    )(shift.reshape(B, 1, D), scale.reshape(B, 1, D), x)


# -----------------------------------------------------------------------------
# Pallas kernel 2: fused gated residual + LayerNorm + modulation (two outputs)
#   x_new = x + gate * y
#   norm  = LayerNorm(x_new) * (1 + scale) + shift
# -----------------------------------------------------------------------------
def _residual_ln_modulate_kernel(gate_ref, shift_ref, scale_ref, x_ref, y_ref,
                                 xnew_ref, norm_ref, *, eps):
    g = gate_ref[0].astype(jnp.float32)                    # (1, D)
    x = x_ref[0].astype(jnp.float32)                       # (TILE_T, D)
    y = y_ref[0].astype(jnp.float32)
    xn = x + g * y
    xnew_ref[0] = xn.astype(xnew_ref.dtype)
    mean = jnp.mean(xn, axis=-1, keepdims=True)
    xc = xn - mean
    var = jnp.mean(xc * xc, axis=-1, keepdims=True)
    normed = xc * jax.lax.rsqrt(var + eps)
    scale = scale_ref[0].astype(jnp.float32)
    shift = shift_ref[0].astype(jnp.float32)
    norm_ref[0] = (normed * (1.0 + scale) + shift).astype(norm_ref.dtype)


def residual_gate_ln_modulate(x, y, gate, shift, scale, *, eps=1e-6):
    """x,y: (B,T,D); gate/shift/scale: (B,D) -> (x + gate*y, LN_mod(x+gate*y))."""
    B, T, D = x.shape
    tile_t = _pick_tile_t(T, D, x.dtype, n_big_streams=4)
    grid = (B, pl.cdiv(T, tile_t))
    vec_spec = pl.BlockSpec((1, 1, D), lambda b, t: (b, 0, 0))
    big_spec = pl.BlockSpec((1, tile_t, D), lambda b, t: (b, t, 0))
    itemsize = jnp.dtype(x.dtype).itemsize
    cost = pl.CostEstimate(flops=10 * B * T * D, transcendentals=B * T,
                           bytes_accessed=4 * B * T * D * itemsize + 3 * B * D * 4)
    return pl.pallas_call(
        functools.partial(_residual_ln_modulate_kernel, eps=eps),
        out_shape=(jax.ShapeDtypeStruct((B, T, D), x.dtype),
                   jax.ShapeDtypeStruct((B, T, D), x.dtype)),
        grid_spec=pltpu.PrefetchScalarGridSpec(
            num_scalar_prefetch=0, grid=grid,
            in_specs=[vec_spec, vec_spec, vec_spec, big_spec, big_spec],
            out_specs=[big_spec, big_spec]),
        compiler_params=pltpu.CompilerParams(
            dimension_semantics=("parallel", "parallel")),
        cost_estimate=cost,
    )(gate.reshape(B, 1, D), shift.reshape(B, 1, D), scale.reshape(B, 1, D), x, y)


# -----------------------------------------------------------------------------
# Pallas kernel 3: gated residual add  out = x + gate * y
# -----------------------------------------------------------------------------
def _residual_gate_kernel(gate_ref, x_ref, y_ref, o_ref):
    g = gate_ref[0].astype(jnp.float32)
    x = x_ref[0].astype(jnp.float32)
    y = y_ref[0].astype(jnp.float32)
    o_ref[0] = (x + g * y).astype(o_ref.dtype)


def residual_gate(x, y, gate):
    B, T, D = x.shape
    tile_t = _pick_tile_t(T, D, x.dtype, n_big_streams=3)
    grid = (B, pl.cdiv(T, tile_t))
    vec_spec = pl.BlockSpec((1, 1, D), lambda b, t: (b, 0, 0))
    big_spec = pl.BlockSpec((1, tile_t, D), lambda b, t: (b, t, 0))
    itemsize = jnp.dtype(x.dtype).itemsize
    cost = pl.CostEstimate(flops=2 * B * T * D, transcendentals=0,
                           bytes_accessed=3 * B * T * D * itemsize + B * D * 4)
    return pl.pallas_call(
        _residual_gate_kernel,
        out_shape=jax.ShapeDtypeStruct((B, T, D), x.dtype),
        grid_spec=pltpu.PrefetchScalarGridSpec(
            num_scalar_prefetch=0, grid=grid,
            in_specs=[vec_spec, big_spec, big_spec],
            out_specs=big_spec),
        compiler_params=pltpu.CompilerParams(
            dimension_semantics=("parallel", "parallel")),
        cost_estimate=cost,
    )(gate.reshape(B, 1, D), x, y)


# -----------------------------------------------------------------------------
# Pallas kernel 4: flash attention (online softmax) with additive key bias
#   q,k,v: (BH, T, dh);  bias: (BH, 1, T) = 0 (attend) / -1e30 (masked key)
# -----------------------------------------------------------------------------
def _flash_attn_kernel(bias_ref, q_ref, k_ref, v_ref, o_ref,
                       m_sc, l_sc, acc_sc, *, scale):
    ki = pl.program_id(2)

    @pl.when(ki == 0)
    def _():
        m_sc[...] = jnp.full_like(m_sc, -jnp.inf)
        l_sc[...] = jnp.zeros_like(l_sc)
        acc_sc[...] = jnp.zeros_like(acc_sc)

    q = q_ref[0]                                           # (tq, dh), caller dtype
    k = k_ref[0]                                           # (tk, dh)
    s = jax.lax.dot_general(q, k, (((1,), (1,)), ((), ())),
                            preferred_element_type=jnp.float32)   # (tq, tk) f32
    s = s * scale + bias_ref[0].astype(jnp.float32)        # + (1, tk) key mask

    m_prev = m_sc[...]
    m_new = jnp.maximum(m_prev, s.max(axis=-1, keepdims=True))
    alpha = jnp.exp(m_prev - m_new)
    p = jnp.exp(s - m_new)
    l_sc[...] = alpha * l_sc[...] + p.sum(axis=-1, keepdims=True)
    acc_sc[...] = alpha * acc_sc[...] + jnp.dot(
        p.astype(v_ref.dtype), v_ref[0], preferred_element_type=jnp.float32)
    m_sc[...] = m_new

    @pl.when(ki == pl.num_programs(2) - 1)
    def _():
        inv_l = pl.reciprocal(l_sc[...], approx=False)     # exact: f32 output path
        o_ref[0] = (acc_sc[...] * inv_l).astype(o_ref.dtype)


def flash_attention(q, k, v, kbias, *, block_q=256, block_k=256):
    """q,k,v: (BH, T, dh); kbias: (BH, 1, T) f32 additive key bias -> (BH, T, dh)."""
    BH, T, dh = q.shape

    def fit(blk):
        blk = min(blk, T)
        # TODO(synk): ragged T (not a multiple of the block) falls back to a
        # whole-sequence block; a masked partial-tile path would be better.
        return blk if T % blk == 0 else T

    tq, tk = fit(block_q), fit(block_k)
    grid = (BH, T // tq, T // tk)
    scale = 1.0 / math.sqrt(dh)

    q_spec = pl.BlockSpec((1, tq, dh), lambda b, qi, ki: (b, qi, 0))
    kv_spec = pl.BlockSpec((1, tk, dh), lambda b, qi, ki: (b, ki, 0))
    bias_spec = pl.BlockSpec((1, 1, tk), lambda b, qi, ki: (b, 0, ki))
    o_spec = pl.BlockSpec((1, tq, dh), lambda b, qi, ki: (b, qi, 0))

    itemsize = jnp.dtype(q.dtype).itemsize
    cost = pl.CostEstimate(
        flops=4 * BH * T * T * dh,
        transcendentals=BH * T * T,
        bytes_accessed=4 * BH * T * dh * itemsize + BH * T * 4)

    return pl.pallas_call(
        functools.partial(_flash_attn_kernel, scale=scale),
        out_shape=jax.ShapeDtypeStruct((BH, T, dh), q.dtype),
        grid_spec=pltpu.PrefetchScalarGridSpec(
            num_scalar_prefetch=0, grid=grid,
            in_specs=[bias_spec, q_spec, kv_spec, kv_spec],
            out_specs=o_spec,
            scratch_shapes=[pltpu.VMEM((tq, 1), jnp.float32),
                            pltpu.VMEM((tq, 1), jnp.float32),
                            pltpu.VMEM((tq, dh), jnp.float32)]),
        compiler_params=pltpu.CompilerParams(
            dimension_semantics=("parallel", "parallel", "arbitrary")),
        cost_estimate=cost,
    )(kbias, q, k, v)


# -----------------------------------------------------------------------------
# XLA-side pieces (MXU matmuls stay in XLA)
# -----------------------------------------------------------------------------
def _adaln_project(t_emb, w, b, D):
    """proj = Linear(SiLU(t_emb)); returns the 6 chunks (each (B, D), f32)."""
    e = t_emb.astype(jnp.float32)
    e = e * jax.nn.sigmoid(e)                                # SiLU
    proj = e @ w.astype(jnp.float32) + b.astype(jnp.float32)  # (B, 6D)
    return [proj[:, i * D:(i + 1) * D] for i in range(6)]


def _attention(x, p, heads, dim_head, mask=None):
    """Multi-head self-attention; flash-attention Pallas kernel inside."""
    B, T, _ = x.shape
    dh = dim_head
    q = x @ p["wq"] + p["bq"]
    k = x @ p["wk"] + p["bk"]
    v = x @ p["wv"] + p["bv"]

    def split(a):                                            # (B,T,H*dh)->(B*H,T,dh)
        return a.reshape(B, T, heads, dh).transpose(0, 2, 1, 3).reshape(B * heads, T, dh)

    q, k, v = split(q), split(k), split(v)

    if mask is not None:                                     # bool (B,T): True=attend
        kbias = jnp.where(mask, 0.0, -1e30).astype(jnp.float32)
    else:
        kbias = jnp.zeros((B, T), jnp.float32)
    kbias = jnp.broadcast_to(kbias[:, None, None, :],
                             (B, heads, 1, T)).reshape(B * heads, 1, T)

    out = flash_attention(q, k, v, kbias)                    # (B*H, T, dh)
    out = out.reshape(B, heads, T, dh).transpose(0, 2, 1, 3).reshape(B, T, heads * dh)
    out = out @ p["wo"] + p["bo"]
    if mask is not None:                                     # zero masked query rows
        out = jnp.where(mask[:, :, None], out, 0.0)
    return out


def _feedforward(x, p):
    h = x @ p["ff_w1"] + p["ff_b1"]
    h = jax.nn.gelu(h, approximate=True)                     # GELU(approximate='tanh')
    return h @ p["ff_w2"] + p["ff_b2"]
    # TODO(synk): nn.Dropout layers are identity at inference and are omitted.


# -----------------------------------------------------------------------------
# DiTBlock forward (Pallas-backed) and pure-JAX reference
# -----------------------------------------------------------------------------
def dit_block_forward(x, t_emb, params, *, heads, dim_head, mask=None):
    B, T, D = x.shape
    (shift_msa, scale_msa, gate_msa,
     shift_mlp, scale_mlp, gate_mlp) = _adaln_project(
        t_emb, params["ada_w"], params["ada_b"], D)

    norm1 = ln_modulate(x, shift_msa, scale_msa)              # AdaLayerNorm
    attn_out = _attention(norm1, params, heads, dim_head, mask)
    # Fused: x = x + gate_msa*attn ; norm2 = LN(x)*(1+scale_mlp)+shift_mlp
    x, norm2 = residual_gate_ln_modulate(x, attn_out, gate_msa, shift_mlp, scale_mlp)
    ff_out = _feedforward(norm2, params)
    x = residual_gate(x, ff_out, gate_mlp)                    # x + gate_mlp * ff
    return x


def dit_block_ref(x, t_emb, params, *, heads, dim_head, mask=None):
    """Pure-JAX reference mirroring the PyTorch DiTBlock (eval mode)."""
    B, T, D = x.shape
    (shift_msa, scale_msa, gate_msa,
     shift_mlp, scale_mlp, gate_mlp) = _adaln_project(
        t_emb, params["ada_w"], params["ada_b"], D)

    def ln_mod(xx, sh, sc):
        xf = xx.astype(jnp.float32)
        mean = jnp.mean(xf, axis=-1, keepdims=True)
        var = jnp.mean((xf - mean) ** 2, axis=-1, keepdims=True)
        xn = (xf - mean) * jax.lax.rsqrt(var + 1e-6)
        return (xn * (1.0 + sc[:, None, :]) + sh[:, None, :]).astype(xx.dtype)

    def attn_ref(xx):
        q = xx @ params["wq"] + params["bq"]
        k = xx @ params["wk"] + params["bk"]
        v = xx @ params["wv"] + params["bv"]

        def split(a):
            return a.reshape(B, T, heads, dim_head).transpose(0, 2, 1, 3)

        q, k, v = split(q), split(k), split(v)
        logits = jnp.einsum("bhqd,bhkd->bhqk", q, k,
                            preferred_element_type=jnp.float32) / math.sqrt(dim_head)
        if mask is not None:
            logits = jnp.where(mask[:, None, None, :], logits, -1e30)
        probs = jax.nn.softmax(logits, axis=-1).astype(v.dtype)
        o = jnp.einsum("bhqk,bhkd->bhqd", probs, v,
                       preferred_element_type=jnp.float32).astype(xx.dtype)
        o = o.transpose(0, 2, 1, 3).reshape(B, T, heads * dim_head)
        o = o @ params["wo"] + params["bo"]
        if mask is not None:
            o = jnp.where(mask[:, :, None], o, 0.0)
        return o

    norm = ln_mod(x, shift_msa, scale_msa)
    a = attn_ref(norm)
    x = (x.astype(jnp.float32) + gate_msa[:, None, :] * a.astype(jnp.float32)).astype(x.dtype)
    norm2 = ln_mod(x, shift_mlp, scale_mlp)
    f = _feedforward(norm2, params)
    x = (x.astype(jnp.float32) + gate_mlp[:, None, :] * f.astype(jnp.float32)).astype(x.dtype)
    return x


if __name__ == "__main__":
    # Small but lane-aligned shapes (D multiple of 128, T multiple of 8).
    B, T, D = 2, 16, 128
    heads, dim_head = 2, 64          # inner_dim = 128
    ff_mult = 2
    ff_inner = D * ff_mult
    inner = heads * dim_head

    key = jax.random.PRNGKey(0)
    keys = jax.random.split(key, 16)

    def lin(k, fan_in, shape):
        bound = 1.0 / math.sqrt(fan_in)
        return jax.random.uniform(k, shape, minval=-bound, maxval=bound,
                                  dtype=jnp.float32)

    params = {
        # nn.Linear weights stored transposed: (in_features, out_features).
        "ada_w": lin(keys[0], D, (D, 6 * D)),
        "ada_b": lin(keys[1], D, (6 * D,)),
        "wq": lin(keys[2], D, (D, inner)), "bq": lin(keys[3], D, (inner,)),
        "wk": lin(keys[4], D, (D, inner)), "bk": lin(keys[5], D, (inner,)),
        "wv": lin(keys[6], D, (D, inner)), "bv": lin(keys[7], D, (inner,)),
        "wo": lin(keys[8], inner, (inner, D)), "bo": lin(keys[9], inner, (D,)),
        "ff_w1": lin(keys[10], D, (D, ff_inner)), "ff_b1": lin(keys[11], D, (ff_inner,)),
        "ff_w2": lin(keys[12], ff_inner, (ff_inner, D)), "ff_b2": lin(keys[13], ff_inner, (D,)),
    }

    x = jax.random.normal(keys[14], (B, T, D), dtype=jnp.float32)
    t_emb = jax.random.normal(keys[15], (B, D), dtype=jnp.float32)
    # Padding mask: batch 0 fully valid, batch 1 with the last 4 positions masked.
    mask = jnp.arange(T)[None, :] < jnp.array([[T], [T - 4]])

    run = jax.jit(lambda xx, tt, pp, mm: dit_block_forward(
        xx, tt, pp, heads=heads, dim_head=dim_head, mask=mm))

    # ---- f32 path: strict check vs. pure-JAX reference ----
    out = jax.block_until_ready(run(x, t_emb, params, mask))
    ref = dit_block_ref(x, t_emb, params, heads=heads, dim_head=dim_head, mask=mask)
    assert out.shape == ref.shape, (out.shape, ref.shape)
    err = float(jnp.max(jnp.abs(out - ref)))
    assert jnp.allclose(out, ref, atol=3e-4, rtol=3e-4), err

    # ---- bf16 I/O smoke test (kernels keep f32 reduction math internally) ----
    p16 = jax.tree_util.tree_map(lambda a: a.astype(jnp.bfloat16), params)
    out16 = jax.block_until_ready(
        run(x.astype(jnp.bfloat16), t_emb.astype(jnp.bfloat16), p16, mask))
    out16_f32 = out16.astype(jnp.float32)
    err16 = float(jnp.max(jnp.abs(out16_f32 - ref)))
    assert bool(jnp.all(jnp.isfinite(out16_f32))) and err16 < 0.3, err16

    print("KERNEL_OK")
</pallas_src>

<mosaic_0001>
module attributes {stable_mosaic.version = 11 : i64} {
  func.func @_ln_modulate_kernel(%arg0: i32, %arg1: i32, %arg2: memref<1x1x128xf32, #tpu.memory_space<vmem>>, %arg3: memref<1x1x128xf32, #tpu.memory_space<vmem>>, %arg4: memref<1x16x128xf32, #tpu.memory_space<vmem>>, %arg5: memref<1x16x128xf32, #tpu.memory_space<vmem>>) attributes {dimension_semantics = [#tpu.dimension_semantics<parallel>, #tpu.dimension_semantics<parallel>], iteration_bounds = array<i64: 2, 1>, scalar_prefetch = 0 : i64, scratch_operands = 0 : i64, tpu.core_type = #tpu.core_type<tc>, window_params = [{transform_indices = @transform_0, window_bounds = array<i64: 1, 1, 128>}, {transform_indices = @transform_1, window_bounds = array<i64: 1, 1, 128>}, {transform_indices = @transform_2, window_bounds = array<i64: 1, 16, 128>}, {transform_indices = @transform_3, window_bounds = array<i64: 1, 16, 128>}]} {
    %c0 = arith.constant 0 : index
    %c0_0 = arith.constant 0 : index
    %c0_1 = arith.constant 0 : index
    %0 = vector.load %arg4[%c0, %c0_0, %c0_1] : memref<1x16x128xf32, #tpu.memory_space<vmem>>, vector<1x16x128xf32>
    %1 = vector.shape_cast %0 : vector<1x16x128xf32> to vector<16x128xf32>
    %cst = arith.constant dense<0.000000e+00> : vector<16xf32>
    %2 = vector.multi_reduction <add>, %1, %cst [1] : vector<16x128xf32> to vector<16xf32>
    %3 = vector.shape_cast %2 : vector<16xf32> to vector<16x1xf32>
    %cst_2 = arith.constant 1.280000e+02 : f32
    %4 = vector.broadcast %cst_2 : f32 to vector<16x1xf32>
    %5 = arith.divf %3, %4 : vector<16x1xf32>
    %6 = vector.broadcast %5 : vector<16x1xf32> to vector<16x128xf32>
    %7 = arith.subf %1, %6 : vector<16x128xf32>
    %8 = arith.mulf %7, %7 : vector<16x128xf32>
    %cst_3 = arith.constant dense<0.000000e+00> : vector<16xf32>
    %9 = vector.multi_reduction <add>, %8, %cst_3 [1] : vector<16x128xf32> to vector<16xf32>
    %10 = vector.shape_cast %9 : vector<16xf32> to vector<16x1xf32>
    %cst_4 = arith.constant 1.280000e+02 : f32
    %11 = vector.broadcast %cst_4 : f32 to vector<16x1xf32>
    %12 = arith.divf %10, %11 : vector<16x1xf32>
    %cst_5 = arith.constant 9.99999997E-7 : f32
    %13 = vector.broadcast %cst_5 : f32 to vector<16x1xf32>
    %14 = arith.addf %12, %13 : vector<16x1xf32>
    %15 = math.rsqrt %14 : vector<16x1xf32>
    %16 = vector.broadcast %15 : vector<16x1xf32> to vector<16x128xf32>
    %17 = arith.mulf %7, %16 : vector<16x128xf32>
    %c0_6 = arith.constant 0 : index
    %c0_7 = arith.constant 0 : index
    %c0_8 = arith.constant 0 : index
    %18 = vector.load %arg3[%c0_6, %c0_7, %c0_8] : memref<1x1x128xf32, #tpu.memory_space<vmem>>, vector<1x1x128xf32>
    %19 = vector.shape_cast %18 : vector<1x1x128xf32> to vector<1x128xf32>
    %c0_9 = arith.constant 0 : index
    %c0_10 = arith.constant 0 : index
    %c0_11 = arith.constant 0 : index
    %20 = vector.load %arg2[%c0_9, %c0_10, %c0_11] : memref<1x1x128xf32, #tpu.memory_space<vmem>>, vector<1x1x128xf32>
    %21 = vector.shape_cast %20 : vector<1x1x128xf32> to vector<1x128xf32>
    %cst_12 = arith.constant 1.000000e+00 : f32
    %22 = vector.broadcast %cst_12 : f32 to vector<1x128xf32>
    %23 = arith.addf %22, %19 : vector<1x128xf32>
    %24 = vector.broadcast %23 : vector<1x128xf32> to vector<16x128xf32>
    %25 = arith.mulf %17, %24 : vector<16x128xf32>
    %26 = vector.broadcast %21 : vector<1x128xf32> to vector<16x128xf32>
    %27 = arith.addf %25, %26 : vector<16x128xf32>
    %c0_13 = arith.constant 0 : index
    %c0_14 = arith.constant 0 : index
    %c0_15 = arith.constant 0 : index
    %28 = vector.load %arg5[%c0_13, %c0_14, %c0_15] : memref<1x16x128xf32, #tpu.memory_space<vmem>>, vector<1x16x128xf32>
    %29 = vector.shape_cast %28 : vector<1x16x128xf32> to vector<16x128xf32>
    %30 = vector.shape_cast %27 : vector<16x128xf32> to vector<1x16x128xf32>
    tpu.vector_store %arg5[%c0_13, %c0_14, %c0_15], %30 {strides = array<i32>} : memref<1x16x128xf32, #tpu.memory_space<vmem>>, vector<1x16x128xf32>,
    return
  }
  func.func @transform_0(%arg0: i32, %arg1: i32) -> (i32, i32, i32) {
    %c0_i32 = arith.constant 0 : i32
    %c0_i32_0 = arith.constant 0 : i32
    %c0_i32_1 = arith.constant 0 : i32
    return %arg0, %c0_i32, %c0_i32_0 : i32, i32, i32
  }
  func.func @transform_1(%arg0: i32, %arg1: i32) -> (i32, i32, i32) {
    %c0_i32 = arith.constant 0 : i32
    %c0_i32_0 = arith.constant 0 : i32
    %c0_i32_1 = arith.constant 0 : i32
    return %arg0, %c0_i32, %c0_i32_0 : i32, i32, i32
  }
  func.func @transform_2(%arg0: i32, %arg1: i32) -> (i32, i32, i32) {
    %c0_i32 = arith.constant 0 : i32
    %c0_i32_0 = arith.constant 0 : i32
    return %arg0, %arg1, %c0_i32 : i32, i32, i32
  }
  func.func @transform_3(%arg0: i32, %arg1: i32) -> (i32, i32, i32) {
    %c0_i32 = arith.constant 0 : i32
    %c0_i32_0 = arith.constant 0 : i32
    return %arg0, %arg1, %c0_i32 : i32, i32, i32
  }
}

module attributes {stable_mosaic.version = 11 : i64} {
  func.func @_flash_attn_kernel(%arg0: i32, %arg1: i32, %arg2: i32, %arg3: memref<1x1x16xf32, #tpu.memory_space<vmem>>, %arg4: memref<1x16x64xf32, #tpu.memory_space<vmem>>, %arg5: memref<1x16x64xf32, #tpu.memory_space<vmem>>, %arg6: memref<1x16x64xf32, #tpu.memory_space<vmem>>, %arg7: memref<1x16x64xf32, #tpu.memory_space<vmem>>, %arg8: memref<16x1xf32, #tpu.memory_space<vmem>>, %arg9: memref<16x1xf32, #tpu.memory_space<vmem>>, %arg10: memref<16x64xf32, #tpu.memory_space<vmem>>) attributes {dimension_semantics = [#tpu.dimension_semantics<parallel>, #tpu.dimension_semantics<parallel>, #tpu.dimension_semantics<arbitrary>], iteration_bounds = array<i64: 4, 1, 1>, scalar_prefetch = 0 : i64, scratch_operands = 3 : i64, tpu.core_type = #tpu.core_type<tc>, window_params = [{transform_indices = @transform_0, window_bounds = array<i64: 1, 1, 16>}, {transform_indices = @transform_1, window_bounds = array<i64: 1, 16, 64>}, {transform_indices = @transform_2, window_bounds = array<i64: 1, 16, 64>}, {transform_indices = @transform_3, window_bounds = array<i64: 1, 16, 64>}, {transform_indices = @transform_4, window_bounds = array<i64: 1, 16, 64>}]} {
    %c0_i32 = arith.constant 0 : i32
    %0 = arith.cmpi eq, %arg2, %c0_i32 : i32
    %1 = arith.extui %0 : i1 to i32
    %c0_i32_0 = arith.constant 0 : i32
    %2 = arith.cmpi ne, %1, %c0_i32_0 : i32
    scf.if %2 {
      %cst_30 = arith.constant 0xFF800000 : f32
      %41 = vector.broadcast %cst_30 : f32 to vector<16x1xf32>
      %c0_31 = arith.constant 0 : index
      %c0_32 = arith.constant 0 : index
      %42 = vector.load %arg8[%c0_31, %c0_32] : memref<16x1xf32, #tpu.memory_space<vmem>>, vector<16x1xf32>
      tpu.vector_store %arg8[%c0_31, %c0_32], %41 {strides = array<i32>} : memref<16x1xf32, #tpu.memory_space<vmem>>, vector<16x1xf32>,
      %cst_33 = arith.constant 0.000000e+00 : f32
      %43 = vector.broadcast %cst_33 : f32 to vector<16x1xf32>
      %c0_34 = arith.constant 0 : index
      %c0_35 = arith.constant 0 : index
      %44 = vector.load %arg9[%c0_34, %c0_35] : memref<16x1xf32, #tpu.memory_space<vmem>>, vector<16x1xf32>
      tpu.vector_store %arg9[%c0_34, %c0_35], %43 {strides = array<i32>} : memref<16x1xf32, #tpu.memory_space<vmem>>, vector<16x1xf32>,
      %cst_36 = arith.constant 0.000000e+00 : f32
      %45 = vector.broadcast %cst_36 : f32 to vector<16x64xf32>
      %c0_37 = arith.constant 0 : index
      %c0_38 = arith.constant 0 : index
      %46 = vector.load %arg10[%c0_37, %c0_38] : memref<16x64xf32, #tpu.memory_space<vmem>>, vector<16x64xf32>
      tpu.vector_store %arg10[%c0_37, %c0_38], %45 {strides = array<i32>} : memref<16x64xf32, #tpu.memory_space<vmem>>, vector<16x64xf32>,
    } else {
    }
    %c0 = arith.constant 0 : index
    %c0_1 = arith.constant 0 : index
    %c0_2 = arith.constant 0 : index
    %3 = vector.load %arg4[%c0, %c0_1, %c0_2] : memref<1x16x64xf32, #tpu.memory_space<vmem>>, vector<1x16x64xf32>
    %4 = vector.shape_cast %3 : vector<1x16x64xf32> to vector<16x64xf32>
    %c0_3 = arith.constant 0 : index
    %c0_4 = arith.constant 0 : index
    %c0_5 = arith.constant 0 : index
    %5 = vector.load %arg5[%c0_3, %c0_4, %c0_5] : memref<1x16x64xf32, #tpu.memory_space<vmem>>, vector<1x16x64xf32>
    %6 = vector.shape_cast %5 : vector<1x16x64xf32> to vector<16x64xf32>
    %cst = arith.constant dense<0.000000e+00> : vector<16x16xf32>
    %7 = tpu.matmul %4, %6, %cst {dimension_numbers = #tpu.dot_dimension_numbers<[1], [1], [0], [0], [0, 0, 1, 0], [], []>} : vector<16x64xf32>, vector<16x64xf32>, vector<16x16xf32> -> vector<16x16xf32>
    %cst_6 = arith.constant 1.250000e-01 : f32
    %8 = vector.broadcast %cst_6 : f32 to vector<16x16xf32>
    %9 = arith.mulf %7, %8 : vector<16x16xf32>
    %c0_7 = arith.constant 0 : index
    %c0_8 = arith.constant 0 : index
    %c0_9 = arith.constant 0 : index
    %10 = vector.load %arg3[%c0_7, %c0_8, %c0_9] : memref<1x1x16xf32, #tpu.memory_space<vmem>>, vector<1x1x16xf32>
    %11 = vector.shape_cast %10 : vector<1x1x16xf32> to vector<1x16xf32>
    %12 = vector.broadcast %11 : vector<1x16xf32> to vector<16x16xf32>
    %13 = arith.addf %9, %12 : vector<16x16xf32>
    %c0_10 = arith.constant 0 : index
    %c0_11 = arith.constant 0 : index
    %14 = vector.load %arg8[%c0_10, %c0_11] : memref<16x1xf32, #tpu.memory_space<vmem>>, vector<16x1xf32>
    %cst_12 = arith.constant dense<0xFF800000> : vector<16xf32>
    %15 = vector.multi_reduction <maximumf>, %13, %cst_12 [1] : vector<16x16xf32> to vector<16xf32>
    %16 = vector.shape_cast %15 : vector<16xf32> to vector<16x1xf32>
    %17 = arith.maximumf %14, %16 : vector<16x1xf32>
    %18 = arith.subf %14, %17 : vector<16x1xf32>
    %19 = math.exp %18 : vector<16x1xf32>
    %20 = vector.broadcast %17 : vector<16x1xf32> to vector<16x16xf32>
    %21 = arith.subf %13, %20 : vector<16x16xf32>
    %22 = math.exp %21 : vector<16x16xf32>
    %c0_13 = arith.constant 0 : index
    %c0_14 = arith.constant 0 : index
    %23 = vector.load %arg9[%c0_13, %c0_14] : memref<16x1xf32, #tpu.memory_space<vmem>>, vector<16x1xf32>
    %24 = arith.mulf %19, %23 : vector<16x1xf32>
    %cst_15 = arith.constant dense<0.000000e+00> : vector<16xf32>
    %25 = vector.multi_reduction <add>, %22, %cst_15 [1] : vector<16x16xf32> to vector<16xf32>
    %26 = vector.shape_cast %25 : vector<16xf32> to vector<16x1xf32>
    %27 = arith.addf %24, %26 : vector<16x1xf32>
    %c0_16 = arith.constant 0 : index
    %c0_17 = arith.constant 0 : index
    %28 = vector.load %arg9[%c0_16, %c0_17] : memref<16x1xf32, #tpu.memory_space<vmem>>, vector<16x1xf32>
    tpu.vector_store %arg9[%c0_16, %c0_17], %27 {strides = array<i32>} : memref<16x1xf32, #tpu.memory_space<vmem>>, vector<16x1xf32>,
    %c0_18 = arith.constant 0 : index
    %c0_19 = arith.constant 0 : index
    %29 = vector.load %arg10[%c0_18, %c0_19] : memref<16x64xf32, #tpu.memory_space<vmem>>, vector<16x64xf32>
    %30 = vector.broadcast %19 : vector<16x1xf32> to vector<16x64xf32>
    %31 = arith.mulf %30, %29 : vector<16x64xf32>
    %c0_20 = arith.constant 0 : index
    %c0_21 = arith.constant 0 : index
    %c0_22 = arith.constant 0 : index
    %32 = vector.load %arg6[%c0_20, %c0_21, %c0_22] : memref<1x16x64xf32, #tpu.memory_space<vmem>>, vector<1x16x64xf32>
    %33 = vector.shape_cast %32 : vector<1x16x64xf32> to vector<16x64xf32>
    %cst_23 = arith.constant dense<0.000000e+00> : vector<16x64xf32>
    %34 = tpu.matmul %22, %33, %cst_23 {dimension_numbers = #tpu.dot_dimension_numbers<[1], [0], [0], [1], [0, 0, 1, 1], [], []>} : vector<16x16xf32>, vector<16x64xf32>, vector<16x64xf32> -> vector<16x64xf32>
    %35 = arith.addf %31, %34 : vector<16x64xf32>
    %c0_24 = arith.constant 0 : index
    %c0_25 = arith.constant 0 : index
    %36 = vector.load %arg10[%c0_24, %c0_25] : memref<16x64xf32, #tpu.memory_space<vmem>>, vector<16x64xf32>
    tpu.vector_store %arg10[%c0_24, %c0_25], %35 {strides = array<i32>} : memref<16x64xf32, #tpu.memory_space<vmem>>, vector<16x64xf32>,
    %c0_26 = arith.constant 0 : index
    %c0_27 = arith.constant 0 : index
    %37 = vector.load %arg8[%c0_26, %c0_27] : memref<16x1xf32, #tpu.memory_space<vmem>>, vector<16x1xf32>
    tpu.vector_store %arg8[%c0_26, %c0_27], %17 {strides = array<i32>} : memref<16x1xf32, #tpu.memory_space<vmem>>, vector<16x1xf32>,
    %c0_i32_28 = arith.constant 0 : i32
    %38 = arith.cmpi eq, %arg2, %c0_i32_28 : i32
    %39 = arith.extui %38 : i1 to i32
    %c0_i32_29 = arith.constant 0 : i32
    %40 = arith.cmpi ne, %39, %c0_i32_29 : i32
    scf.if %40 {
      %c0_30 = arith.constant 0 : index
      %c0_31 = arith.constant 0 : index
      %41 = vector.load %arg9[%c0_30, %c0_31] : memref<16x1xf32, #tpu.memory_space<vmem>>, vector<16x1xf32>
      %42 = tpu.reciprocal %41 : vector<16x1xf32> -> vector<16x1xf32>
      %c0_32 = arith.constant 0 : index
      %c0_33 = arith.constant 0 : index
      %43 = vector.load %arg10[%c0_32, %c0_33] : memref<16x64xf32, #tpu.memory_space<vmem>>, vector<16x64xf32>
      %44 = vector.broadcast %42 : vector<16x1xf32> to vector<16x64xf32>
      %45 = arith.mulf %43, %44 : vector<16x64xf32>
      %c0_34 = arith.constant 0 : index
      %c0_35 = arith.constant 0 : index
      %c0_36 = arith.constant 0 : index
      %46 = vector.load %arg7[%c0_34, %c0_35, %c0_36] : memref<1x16x64xf32, #tpu.memory_space<vmem>>, vector<1x16x64xf32>
      %47 = vector.shape_cast %46 : vector<1x16x64xf32> to vector<16x64xf32>
      %48 = vector.shape_cast %45 : vector<16x64xf32> to vector<1x16x64xf32>
      tpu.vector_store %arg7[%c0_34, %c0_35, %c0_36], %48 {strides = array<i32>} : memref<1x16x64xf32, #tpu.memory_space<vmem>>, vector<1x16x64xf32>,
    } else {
    }
    return
  }
  func.func @transform_0(%arg0: i32, %arg1: i32, %arg2: i32) -> (i32, i32, i32) {
    %c0_i32 = arith.constant 0 : i32
    %c0_i32_0 = arith.constant 0 : i32
    return %arg0, %c0_i32, %arg2 : i32, i32, i32
  }
  func.func @transform_1(%arg0: i32, %arg1: i32, %arg2: i32) -> (i32, i32, i32) {
    %c0_i32 = arith.constant 0 : i32
    %c0_i32_0 = arith.constant 0 : i32
    return %arg0, %arg1, %c0_i32 : i32, i32, i32
  }
  func.func @transform_2(%arg0: i32, %arg1: i32, %arg2: i32) -> (i32, i32, i32) {
    %c0_i32 = arith.constant 0 : i32
    %c0_i32_0 = arith.constant 0 : i32
    return %arg0, %arg2, %c0_i32 : i32, i32, i32
  }
  func.func @transform_3(%arg0: i32, %arg1: i32, %arg2: i32) -> (i32, i32, i32) {
    %c0_i32 = arith.constant 0 : i32
    %c0_i32_0 = arith.constant 0 : i32
    return %arg0, %arg2, %c0_i32 : i32, i32, i32
  }
  func.func @transform_4(%arg0: i32, %arg1: i32, %arg2: i32) -> (i32, i32, i32) {
    %c0_i32 = arith.constant 0 : i32
    %c0_i32_0 = arith.constant 0 : i32
    return %arg0, %arg1, %c0_i32 : i32, i32, i32
  }
}

module attributes {stable_mosaic.version = 11 : i64} {
  func.func @_residual_ln_modulate_kernel(%arg0: i32, %arg1: i32, %arg2: memref<1x1x128xf32, #tpu.memory_space<vmem>>, %arg3: memref<1x1x128xf32, #tpu.memory_space<vmem>>, %arg4: memref<1x1x128xf32, #tpu.memory_space<vmem>>, %arg5: memref<1x16x128xf32, #tpu.memory_space<vmem>>, %arg6: memref<1x16x128xf32, #tpu.memory_space<vmem>>, %arg7: memref<1x16x128xf32, #tpu.memory_space<vmem>>, %arg8: memref<1x16x128xf32, #tpu.memory_space<vmem>>) attributes {dimension_semantics = [#tpu.dimension_semantics<parallel>, #tpu.dimension_semantics<parallel>], iteration_bounds = array<i64: 2, 1>, scalar_prefetch = 0 : i64, scratch_operands = 0 : i64, tpu.core_type = #tpu.core_type<tc>, window_params = [{transform_indices = @transform_0, window_bounds = array<i64: 1, 1, 128>}, {transform_indices = @transform_1, window_bounds = array<i64: 1, 1, 128>}, {transform_indices = @transform_2, window_bounds = array<i64: 1, 1, 128>}, {transform_indices = @transform_3, window_bounds = array<i64: 1, 16, 128>}, {transform_indices = @transform_4, window_bounds = array<i64: 1, 16, 128>}, {transform_indices = @transform_5, window_bounds = array<i64: 1, 16, 128>}, {transform_indices = @transform_6, window_bounds = array<i64: 1, 16, 128>}]} {
    %c0 = arith.constant 0 : index
    %c0_0 = arith.constant 0 : index
    %c0_1 = arith.constant 0 : index
    %0 = vector.load %arg2[%c0, %c0_0, %c0_1] : memref<1x1x128xf32, #tpu.memory_space<vmem>>, vector<1x1x128xf32>
    %1 = vector.shape_cast %0 : vector<1x1x128xf32> to vector<1x128xf32>
    %c0_2 = arith.constant 0 : index
    %c0_3 = arith.constant 0 : index
    %c0_4 = arith.constant 0 : index
    %2 = vector.load %arg5[%c0_2, %c0_3, %c0_4] : memref<1x16x128xf32, #tpu.memory_space<vmem>>, vector<1x16x128xf32>
    %3 = vector.shape_cast %2 : vector<1x16x128xf32> to vector<16x128xf32>
    %c0_5 = arith.constant 0 : index
    %c0_6 = arith.constant 0 : index
    %c0_7 = arith.constant 0 : index
    %4 = vector.load %arg6[%c0_5, %c0_6, %c0_7] : memref<1x16x128xf32, #tpu.memory_space<vmem>>, vector<1x16x128xf32>
    %5 = vector.shape_cast %4 : vector<1x16x128xf32> to vector<16x128xf32>
    %6 = vector.broadcast %1 : vector<1x128xf32> to vector<16x128xf32>
    %7 = arith.mulf %6, %5 : vector<16x128xf32>
    %8 = arith.addf %3, %7 : vector<16x128xf32>
    %c0_8 = arith.constant 0 : index
    %c0_9 = arith.constant 0 : index
    %c0_10 = arith.constant 0 : index
    %9 = vector.load %arg7[%c0_8, %c0_9, %c0_10] : memref<1x16x128xf32, #tpu.memory_space<vmem>>, vector<1x16x128xf32>
    %10 = vector.shape_cast %9 : vector<1x16x128xf32> to vector<16x128xf32>
    %11 = vector.shape_cast %8 : vector<16x128xf32> to vector<1x16x128xf32>
    tpu.vector_store %arg7[%c0_8, %c0_9, %c0_10], %11 {strides = array<i32>} : memref<1x16x128xf32, #tpu.memory_space<vmem>>, vector<1x16x128xf32>,
    %cst = arith.constant dense<0.000000e+00> : vector<16xf32>
    %12 = vector.multi_reduction <add>, %8, %cst [1] : vector<16x128xf32> to vector<16xf32>
    %13 = vector.shape_cast %12 : vector<16xf32> to vector<16x1xf32>
    %cst_11 = arith.constant 1.280000e+02 : f32
    %14 = vector.broadcast %cst_11 : f32 to vector<16x1xf32>
    %15 = arith.divf %13, %14 : vector<16x1xf32>
    %16 = vector.broadcast %15 : vector<16x1xf32> to vector<16x128xf32>
    %17 = arith.subf %8, %16 : vector<16x128xf32>
    %18 = arith.mulf %17, %17 : vector<16x128xf32>
    %cst_12 = arith.constant dense<0.000000e+00> : vector<16xf32>
    %19 = vector.multi_reduction <add>, %18, %cst_12 [1] : vector<16x128xf32> to vector<16xf32>
    %20 = vector.shape_cast %19 : vector<16xf32> to vector<16x1xf32>
    %cst_13 = arith.constant 1.280000e+02 : f32
    %21 = vector.broadcast %cst_13 : f32 to vector<16x1xf32>
    %22 = arith.divf %20, %21 : vector<16x1xf32>
    %cst_14 = arith.constant 9.99999997E-7 : f32
    %23 = vector.broadcast %cst_14 : f32 to vector<16x1xf32>
    %24 = arith.addf %22, %23 : vector<16x1xf32>
    %25 = math.rsqrt %24 : vector<16x1xf32>
    %26 = vector.broadcast %25 : vector<16x1xf32> to vector<16x128xf32>
    %27 = arith.mulf %17, %26 : vector<16x128xf32>
    %c0_15 = arith.constant 0 : index
    %c0_16 = arith.constant 0 : index
    %c0_17 = arith.constant 0 : index
    %28 = vector.load %arg4[%c0_15, %c0_16, %c0_17] : memref<1x1x128xf32, #tpu.memory_space<vmem>>, vector<1x1x128xf32>
    %29 = vector.shape_cast %28 : vector<1x1x128xf32> to vector<1x128xf32>
    %c0_18 = arith.constant 0 : index
    %c0_19 = arith.constant 0 : index
    %c0_20 = arith.constant 0 : index
    %30 = vector.load %arg3[%c0_18, %c0_19, %c0_20] : memref<1x1x128xf32, #tpu.memory_space<vmem>>, vector<1x1x128xf32>
    %31 = vector.shape_cast %30 : vector<1x1x128xf32> to vector<1x128xf32>
    %cst_21 = arith.constant 1.000000e+00 : f32
    %32 = vector.broadcast %cst_21 : f32 to vector<1x128xf32>
    %33 = arith.addf %32, %29 : vector<1x128xf32>
    %34 = vector.broadcast %33 : vector<1x128xf32> to vector<16x128xf32>
    %35 = arith.mulf %27, %34 : vector<16x128xf32>
    %36 = vector.broadcast %31 : vector<1x128xf32> to vector<16x128xf32>
    %37 = arith.addf %35, %36 : vector<16x128xf32>
    %c0_22 = arith.constant 0 : index
    %c0_23 = arith.constant 0 : index
    %c0_24 = arith.constant 0 : index
    %38 = vector.load %arg8[%c0_22, %c0_23, %c0_24] : memref<1x16x128xf32, #tpu.memory_space<vmem>>, vector<1x16x128xf32>
    %39 = vector.shape_cast %38 : vector<1x16x128xf32> to vector<16x128xf32>
    %40 = vector.shape_cast %37 : vector<16x128xf32> to vector<1x16x128xf32>
    tpu.vector_store %arg8[%c0_22, %c0_23, %c0_24], %40 {strides = array<i32>} : memref<1x16x128xf32, #tpu.memory_space<vmem>>, vector<1x16x128xf32>,
    return
  }
  func.func @transform_0(%arg0: i32, %arg1: i32) -> (i32, i32, i32) {
    %c0_i32 = arith.constant 0 : i32
    %c0_i32_0 = arith.constant 0 : i32
    %c0_i32_1 = arith.constant 0 : i32
    return %arg0, %c0_i32, %c0_i32_0 : i32, i32, i32
  }
  func.func @transform_1(%arg0: i32, %arg1: i32) -> (i32, i32, i32) {
    %c0_i32 = arith.constant 0 : i32
    %c0_i32_0 = arith.constant 0 : i32
    %c0_i32_1 = arith.constant 0 : i32
    return %arg0, %c0_i32, %c0_i32_0 : i32, i32, i32
  }
  func.func @transform_2(%arg0: i32, %arg1: i32) -> (i32, i32, i32) {
    %c0_i32 = arith.constant 0 : i32
    %c0_i32_0 = arith.constant 0 : i32
    %c0_i32_1 = arith.constant 0 : i32
    return %arg0, %c0_i32, %c0_i32_0 : i32, i32, i32
  }
  func.func @transform_3(%arg0: i32, %arg1: i32) -> (i32, i32, i32) {
    %c0_i32 = arith.constant 0 : i32
    %c0_i32_0 = arith.constant 0 : i32
    return %arg0, %arg1, %c0_i32 : i32, i32, i32
  }
  func.func @transform_4(%arg0: i32, %arg1: i32) -> (i32, i32, i32) {
    %c0_i32 = arith.constant 0 : i32
    %c0_i32_0 = arith.constant 0 : i32
    return %arg0, %arg1, %c0_i32 : i32, i32, i32
  }
  func.func @transform_5(%arg0: i32, %arg1: i32) -> (i32, i32, i32) {
    %c0_i32 = arith.constant 0 : i32
    %c0_i32_0 = arith.constant 0 : i32
    return %arg0, %arg1, %c0_i32 : i32, i32, i32
  }
  func.func @transform_6(%arg0: i32, %arg1: i32) -> (i32, i32, i32) {
    %c0_i32 = arith.constant 0 : i32
    %c0_i32_0 = arith.constant 0 : i32
    return %arg0, %arg1, %c0_i32 : i32, i32, i32
  }
}

module attributes {stable_mosaic.version = 11 : i64} {
  func.func @_residual_gate_kernel(%arg0: i32, %arg1: i32, %arg2: memref<1x1x128xf32, #tpu.memory_space<vmem>>, %arg3: memref<1x16x128xf32, #tpu.memory_space<vmem>>, %arg4: memref<1x16x128xf32, #tpu.memory_space<vmem>>, %arg5: memref<1x16x128xf32, #tpu.memory_space<vmem>>) attributes {dimension_semantics = [#tpu.dimension_semantics<parallel>, #tpu.dimension_semantics<parallel>], iteration_bounds = array<i64: 2, 1>, scalar_prefetch = 0 : i64, scratch_operands = 0 : i64, tpu.core_type = #tpu.core_type<tc>, window_params = [{transform_indices = @transform_0, window_bounds = array<i64: 1, 1, 128>}, {transform_indices = @transform_1, window_bounds = array<i64: 1, 16, 128>}, {transform_indices = @transform_2, window_bounds = array<i64: 1, 16, 128>}, {transform_indices = @transform_3, window_bounds = array<i64: 1, 16, 128>}]} {
    %c0 = arith.constant 0 : index
    %c0_0 = arith.constant 0 : index
    %c0_1 = arith.constant 0 : index
    %0 = vector.load %arg2[%c0, %c0_0, %c0_1] : memref<1x1x128xf32, #tpu.memory_space<vmem>>, vector<1x1x128xf32>
    %1 = vector.shape_cast %0 : vector<1x1x128xf32> to vector<1x128xf32>
    %c0_2 = arith.constant 0 : index
    %c0_3 = arith.constant 0 : index
    %c0_4 = arith.constant 0 : index
    %2 = vector.load %arg3[%c0_2, %c0_3, %c0_4] : memref<1x16x128xf32, #tpu.memory_space<vmem>>, vector<1x16x128xf32>
    %3 = vector.shape_cast %2 : vector<1x16x128xf32> to vector<16x128xf32>
    %c0_5 = arith.constant 0 : index
    %c0_6 = arith.constant 0 : index
    %c0_7 = arith.constant 0 : index
    %4 = vector.load %arg4[%c0_5, %c0_6, %c0_7] : memref<1x16x128xf32, #tpu.memory_space<vmem>>, vector<1x16x128xf32>
    %5 = vector.shape_cast %4 : vector<1x16x128xf32> to vector<16x128xf32>
    %6 = vector.broadcast %1 : vector<1x128xf32> to vector<16x128xf32>
    %7 = arith.mulf %6, %5 : vector<16x128xf32>
    %8 = arith.addf %3, %7 : vector<16x128xf32>
    %c0_8 = arith.constant 0 : index
    %c0_9 = arith.constant 0 : index
    %c0_10 = arith.constant 0 : index
    %9 = vector.load %arg5[%c0_8, %c0_9, %c0_10] : memref<1x16x128xf32, #tpu.memory_space<vmem>>, vector<1x16x128xf32>
    %10 = vector.shape_cast %9 : vector<1x16x128xf32> to vector<16x128xf32>
    %11 = vector.shape_cast %8 : vector<16x128xf32> to vector<1x16x128xf32>
    tpu.vector_store %arg5[%c0_8, %c0_9, %c0_10], %11 {strides = array<i32>} : memref<1x16x128xf32, #tpu.memory_space<vmem>>, vector<1x16x128xf32>,
    return
  }
  func.func @transform_0(%arg0: i32, %arg1: i32) -> (i32, i32, i32) {
    %c0_i32 = arith.constant 0 : i32
    %c0_i32_0 = arith.constant 0 : i32
    %c0_i32_1 = arith.constant 0 : i32
    return %arg0, %c0_i32, %c0_i32_0 : i32, i32, i32
  }
  func.func @transform_1(%arg0: i32, %arg1: i32) -> (i32, i32, i32) {
    %c0_i32 = arith.constant 0 : i32
    %c0_i32_0 = arith.constant 0 : i32
    return %arg0, %arg1, %c0_i32 : i32, i32, i32
  }
  func.func @transform_2(%arg0: i32, %arg1: i32) -> (i32, i32, i32) {
    %c0_i32 = arith.constant 0 : i32
    %c0_i32_0 = arith.constant 0 : i32
    return %arg0, %arg1, %c0_i32 : i32, i32, i32
  }
  func.func @transform_3(%arg0: i32, %arg1: i32) -> (i32, i32, i32) {
    %c0_i32 = arith.constant 0 : i32
    %c0_i32_0 = arith.constant 0 : i32
    return %arg0, %arg1, %c0_i32 : i32, i32, i32
  }
}

</mosaic_0001>

<bundles_post_ra>
// kernel: _lambda_.4
= control target key start
LH: loop header
LB: loop body
LE: loop exit
PB: predicated region body
PF: predicated region fallthrough
CT: control target
= control target key end

     0   :  { %s475_s12 = smov 0   ;;  %s477_s13 = smov 0   ;;  %s523_s0 = inlined_call_operand.vmem [shape: f32[2,1,128], index: 0, kind: input, shape index: {}]   ;;  %s524_s1 = inlined_call_operand.vmem [shape: f32[2,1,128], index: 1, kind: input, shape index: {}]   ;;  %s525_s2 = inlined_call_operand.vmem [shape: f32[2,16,128], index: 2, kind: input, shape index: {}]   ;;  %s526_s3 = inlined_call_operand.vmem [shape: f32[2,16,128], index: 3, kind: output, shape index: {}]  }
   0x1   :  { %s479_s14 = smov 0  }
   0x2 LB: > { %s25_s15 = sadd.s32 1, %s449_s13  ;;  %p393_p0 = scmp.ge.s32.totalorder %s453_s14, 1  ;;  %s453_s14 = sphi %s479_s14, %s13_s14   ;;  %s449_s13 = sphi %s477_s13, %s528_s13   ;;  %s445_s12 = sphi %s475_s12, %s527_s12  }
   0x3   : > { %p27_p1 = scmp.ge.s32.totalorder %s25_s15, 2  ;;  %p174_p2 = scmp.lt.s32.totalorder %s453_s14, 3 }
   0x5   : > { %s530_s15 = smov (%p27_p1, %s25_s15), 0  ;;  %p175_p3 = pnand %p393_p0, %p174_p2 }
   0x6   : > { %p212_p4 = scmp.lt.s32.totalorder (!%p175_p3), %s445_s12, 1 }
   0x7   : > { %178 = sbr.rel (%p175_p3) target bundleno = 327 (0x147), region = 32 }
   0xc   : > { %s532_s12 = smov (!%p212_p4, %s445_s12), 1  ;;  %v267_v14 = vlaneseq }
   0xd   : > { %s401_s16 = sshll.u32 %s532_s12, 4  ;;  %s217_s22 = scalar_lea.vmem %s524_s1, %s532_s12 }
   0xe   : > { %s226_s19 = scalar_lea.vmem %s525_s2, %s401_s16  ;;  %v268_v17 = vshrl.u32 %v267_v14, 7  ;;  %v263_v18 = vld [vmem:[%s217_s22] sm:$0x1]  ;;  %s214_s25 = scalar_lea.vmem %s523_s0, %s532_s12 }
   0xf   : > { %v238_v0 = vld [vmem:[%s226_s19] sm:$0xff]  ;;  %v239_v1 = vld [vmem:[%s226_s19 + $0x8] sm:$0xff]  ;;  %v265_v20 = vadd.f32 1.0, %v263_v18  ;;  %s236_s28 = scalar_lea.vmem %s526_s3, %s401_s16 }
  0x10   : > { %240 = vadd.xlane.f32.xlu0 %v238_v0  ;;  %v269_v19 = vsub.s32 0, %v268_v17  ;;  %v398_v24 = vld [vmem:[%s214_s25] ss:$0 sm:$0xff] }
  0x12   : > { %v270_v21 = vrot.slane %v265_v20, %v269_v19 }
  0x14   : > { %242 = vadd.xlane.f32.xlu0 %v239_v1 }
  0x99   : > { %v241_v2 = vpop.xlane.xlu0 %240 }
  0x9a   : > { %v245_v3 = vmul.f32 0.0078125, %v241_v2 }
  0x9c   : > { %v247_v4 = vsub.f32 %v238_v0, %v245_v3 }
  0x9d   : > { %v243_v5 = vpop.xlane.xlu0 %242 }
  0x9e   : > { %v246_v6 = vmul.f32 0.0078125, %v243_v5  ;;  %v249_v7 = vmul.f32 %v247_v4, %v247_v4 }
  0xa0   : > { %v248_v8 = vsub.f32 %v239_v1, %v246_v6  ;;  %251 = vadd.xlane.f32.xlu1 %v249_v7 }
  0xa2   : > { %v250_v9 = vmul.f32 %v248_v8, %v248_v8 }
  0xa4   : > { %253 = vadd.xlane.f32.xlu1 %v250_v9 }
 0x129   : > { %v252_v10 = vpop.xlane.xlu1 %251 }
 0x12a   : > { %v255_v11 = vmul.f32 0.0078125, %v252_v10 }
 0x12c   : > { %v257_v12 = vadd.f32 1e-06, %v255_v11 }
 0x12d   : > { %v254_v13 = vpop.xlane.xlu1 %253 }
 0x12e   : > { %427 = vrsqrt.f32 %v257_v12  ;;  %v256_v15 = vmul.f32 0.0078125, %v254_v13 }
 0x130   : > { %v258_v16 = vadd.f32 1e-06, %v256_v15 }
 0x132   : > { %429 = vrsqrt.f32 %v258_v16 }
 0x13b   : > { %v428_v22 = vpop.eup %427 }
 0x13c   : > { %v261_v23 = vmul.f32 %v428_v22, %v247_v4 }
 0x13e   : > { %v272_v25 = vmul.f32 %v270_v21, %v261_v23 }
 0x13f   : > { %v430_v26 = vpop.eup %429 }
 0x140   : > { %v280_v27 = vadd.f32 %v398_v24, %v272_v25  ;;  %v262_v28 = vmul.f32 %v430_v26, %v248_v8 }
 0x142   : > { %282 = vst [vmem:[%s236_s28] sm:$0xff] %v280_v27  ;;  %v273_v29 = vmul.f32 %v270_v21, %v262_v28 }
 0x144   : > { %v281_v30 = vadd.f32 %v398_v24, %v273_v29 }
 0x146   : > { %283 = vst [vmem:[%s236_s28 + $0x8] sm:$0xff] %v281_v30 }
 0x147 PF: > { %s13_s14 = sadd.s32 1, %s453_s14   ;;  %s527_s12 = smov %s449_s13 }
 0x148   : > { %p10_p5 = scmp.ge.s32.totalorder %s13_s14, 4   ;;  %s528_s13 = smov %s530_s15 }
 0x14a   :  { %12 = sbr.rel (!%p10_p5) target bundleno = 2 (0x2), region = 68 }

// kernel: _lambda_.6
= control target key start
LH: loop header
LB: loop body
LE: loop exit
PB: predicated region body
PF: predicated region fallthrough
CT: control target
= control target key end

     0   :  { %s744_s21 = smov 0   ;;  %s746_s22 = smov 0   ;;  %s804_s0 = inlined_call_operand.vmem [shape: f32[2,1,128], index: 0, kind: input, shape index: {}]   ;;  %s805_s1 = inlined_call_operand.vmem [shape: f32[2,1,128], index: 1, kind: input, shape index: {}]   ;;  %s806_s2 = inlined_call_operand.vmem [shape: f32[2,1,128], index: 2, kind: input, shape index: {}]   ;;  %s807_s3 = inlined_call_operand.vmem [shape: f32[2,16,128], index: 3, kind: input, shape index: {}]   ;;  %s808_s4 = inlined_call_operand.vmem [shape: f32[2,16,128], index: 4, kind: input, shape index: {}]   ;;  %s809_s5 = inlined_call_operand.vmem [shape: f32[2,16,128], index: 5, kind: output, shape index: {0}]   ;;  %s810_s6 = inlined_call_operand.vmem [shape: f32[2,16,128], index: 6, kind: output, shape index: {1}]  }
   0x1   :  { %s748_s23 = smov 0  }
   0x2 LB: > { %s29_s24 = sadd.s32 1, %s703_s22  ;;  %p640_p0 = scmp.ge.s32.totalorder %s707_s23, 1  ;;  %s707_s23 = sphi %s748_s23, %s17_s23   ;;  %s703_s22 = sphi %s746_s22, %s812_s22   ;;  %s699_s21 = sphi %s744_s21, %s811_s21  }
   0x3   : > { %p31_p1 = scmp.ge.s32.totalorder %s29_s24, 2  ;;  %p279_p2 = scmp.lt.s32.totalorder %s707_s23, 3 }
   0x5   : > { %s814_s24 = smov (%p31_p1, %s29_s24), 0  ;;  %p280_p3 = pnand %p640_p0, %p279_p2 }
   0x6   : > { %p344_p4 = scmp.lt.s32.totalorder (!%p280_p3), %s699_s21, 1 }
   0x7   : > { %283 = sbr.rel (%p280_p3) target bundleno = 332 (0x14c), region = 40 }
   0xc   : > { %s816_s21 = smov (!%p344_p4, %s699_s21), 1  ;;  %v437_v21 = vlaneseq }
   0xd   : > { %s346_s27 = scalar_lea.vmem %s804_s0, %s816_s21  ;;  %s769_s28 = sshll.u32 %s816_s21, 4 }
   0xe   : > { %s361_s7 = scalar_lea.vmem %s807_s3, %s769_s28  ;;  %s371_s10 = scalar_lea.vmem %s808_s4, %s769_s28  ;;  %v649_v0 = vld [vmem:[%s346_s27] ss:$0 sm:$0xff]  ;;  %v438_v24 = vshrl.u32 %v437_v21, 7 }
   0xf   : > { %v394_v1 = vld [vmem:[%s361_s7] sm:$0xff]  ;;  %v395_v4 = vld [vmem:[%s361_s7 + $0x8] sm:$0xff]  ;;  %s381_s13 = scalar_lea.vmem %s809_s5, %s769_s28  ;;  %s352_s16 = scalar_lea.vmem %s806_s2, %s816_s21 }
  0x10   : > { %v396_v2 = vld [vmem:[%s371_s10] sm:$0xff]  ;;  %v397_v5 = vld [vmem:[%s371_s10 + $0x8] sm:$0xff]  ;;  %v439_v27 = vsub.s32 0, %v438_v24  ;;  %s349_s19 = scalar_lea.vmem %s805_s1, %s816_s21  ;;  %s391_s26 = scalar_lea.vmem %s810_s6, %s769_s28 }
  0x11   : > { %v404_v3 = vmul.f32 %v649_v0, %v396_v2  ;;  %v405_v6 = vmul.f32 %v649_v0, %v397_v5  ;;  %v433_v25 = vld [vmem:[%s352_s16] sm:$0x1] }
  0x12   : > { %v435_v26 = vadd.f32 1.0, %v433_v25  ;;  %v650_v31 = vld [vmem:[%s349_s19] ss:$0 sm:$0xff] }
  0x13   : > { %v406_v7 = vadd.f32 %v404_v3, %v394_v1  ;;  %v407_v8 = vadd.f32 %v405_v6, %v395_v4 }
  0x14   : > { %v440_v28 = vrot.slane %v435_v26, %v439_v27 }
  0x15   : > { %410 = vadd.xlane.f32.xlu0 %v406_v7  ;;  %408 = vst [vmem:[%s381_s13] sm:$0xff] %v406_v7  ;;  %409 = vst [vmem:[%s381_s13 + $0x8] sm:$0xff] %v407_v8 }
  0x19   : > { %412 = vadd.xlane.f32.xlu0 %v407_v8 }
  0x9e   : > { %v411_v9 = vpop.xlane.xlu0 %410 }
  0x9f   : > { %v415_v10 = vmul.f32 0.0078125, %v411_v9 }
  0xa1   : > { %v417_v11 = vsub.f32 %v406_v7, %v415_v10 }
  0xa2   : > { %v413_v12 = vpop.xlane.xlu0 %412 }
  0xa3   : > { %v416_v13 = vmul.f32 0.0078125, %v413_v12  ;;  %v419_v14 = vmul.f32 %v417_v11, %v417_v11 }
  0xa5   : > { %v418_v15 = vsub.f32 %v407_v8, %v416_v13  ;;  %421 = vadd.xlane.f32.xlu1 %v419_v14 }
  0xa7   : > { %v420_v16 = vmul.f32 %v418_v15, %v418_v15 }
  0xa9   : > { %423 = vadd.xlane.f32.xlu1 %v420_v16 }
 0x12e   : > { %v422_v17 = vpop.xlane.xlu1 %421 }
 0x12f   : > { %v425_v18 = vmul.f32 0.0078125, %v422_v17 }
 0x131   : > { %v427_v19 = vadd.f32 1e-06, %v425_v18 }
 0x132   : > { %v424_v20 = vpop.xlane.xlu1 %423 }
 0x133   : > { %681 = vrsqrt.f32 %v427_v19  ;;  %v426_v22 = vmul.f32 0.0078125, %v424_v20 }
 0x135   : > { %v428_v23 = vadd.f32 1e-06, %v426_v22 }
 0x137   : > { %683 = vrsqrt.f32 %v428_v23 }
 0x140   : > { %v682_v29 = vpop.eup %681 }
 0x141   : > { %v431_v30 = vmul.f32 %v682_v29, %v417_v11 }
 0x143   : > { %v442_v32 = vmul.f32 %v440_v28, %v431_v30 }
 0x144   : > { %v684_v33 = vpop.eup %683 }
 0x145   : > { %v450_v34 = vadd.f32 %v650_v31, %v442_v32  ;;  %v432_v35 = vmul.f32 %v684_v33, %v418_v15 }
 0x147   : > { %452 = vst [vmem:[%s391_s26] sm:$0xff] %v450_v34  ;;  %v443_v36 = vmul.f32 %v440_v28, %v432_v35 }
 0x149   : > { %v451_v37 = vadd.f32 %v650_v31, %v443_v36 }
 0x14b   : > { %453 = vst [vmem:[%s391_s26 + $0x8] sm:$0xff] %v451_v37 }
 0x14c PF: > { %s17_s23 = sadd.s32 1, %s707_s23   ;;  %s811_s21 = smov %s703_s22 }
 0x14d   : > { %p14_p5 = scmp.ge.s32.totalorder %s17_s23, 4   ;;  %s812_s22 = smov %s814_s24 }
 0x14f   :  { %16 = sbr.rel (!%p14_p5) target bundleno = 2 (0x2), region = 94 }

// kernel: _lambda_.5
= control target key start
LH: loop header
LB: loop body
LE: loop exit
PB: predicated region body
PF: predicated region fallthrough
CT: control target
= control target key end

     0   :  { %s909_s15 = smov 0   ;;  %s911_s16 = smov 0   ;;  %s983_s0 = inlined_call_operand.vmem [shape: f32[4,1,16], index: 0, kind: input, shape index: {}]   ;;  %s984_s1 = inlined_call_operand.vmem [shape: f32[4,16,64], index: 1, kind: input, shape index: {}]   ;;  %s985_s2 = inlined_call_operand.vmem [shape: f32[4,16,64], index: 2, kind: input, shape index: {}]   ;;  %s986_s3 = inlined_call_operand.vmem [shape: f32[4,16,64], index: 3, kind: input, shape index: {}]   ;;  %s987_s4 = inlined_call_operand.vmem [shape: f32[4,16,64], index: 4, kind: output, shape index: {}]  }
   0x1   :  { %s913_s17 = smov 0  }
   0x2 LB: > { %s33_s18 = sadd.s32 1, %s875_s16  ;;  %p772_p0 = scmp.ge.s32.totalorder %s879_s17, 1  ;;  %s879_s17 = sphi %s913_s17, %s14_s17   ;;  %s875_s16 = sphi %s911_s16, %s989_s16   ;;  %s871_s15 = sphi %s909_s15, %s988_s15  }
   0x3   : > { %p35_p1 = scmp.ge.s32.totalorder %s33_s18, 4  ;;  %p237_p2 = scmp.lt.s32.totalorder %s879_s17, 5 }
   0x5   : > { %s991_s18 = smov (%p35_p1, %s33_s18), 0  ;;  %p238_p3 = pnand %p772_p0, %p237_p2 }
   0x6   : > { %p295_p4 = scmp.lt.s32.totalorder (!%p238_p3), %s871_s15, 3 }
   0x7   : > { %241 = sbr.rel (%p238_p3) target bundleno = 800 (0x320), region = 36 }
   0xc   : > { %s993_s15 = smov (!%p295_p4, %s871_s15), 3  ;;  %vm350_vm0 = vcmask 523264   ;;  %vm345_vm1 = vcmask 7168   ;;  %v881_v4 = vmov -inf   ;;  %vm458_vm2 = vcmask 130048  }
   0xd   : > { %s927_s19 = sshll.u32 %s993_s15, 4  ;;  %346 = vst.msk [vmem:[#allocation2] sm:$0xff] %vm345_vm1, %v881_v4  ;;  %347 = vst.msk [vmem:[#allocation2 + $0x8] sm:$0xff] %vm345_vm1, %v881_v4  ;;  %s300_s28 = scalar_lea.vmem %s983_s0, %s993_s15  ;;  %v882_v14 = vmov 0   ;;  %v883_v15 = vmov 0.0  }
   0xe   : > { %s319_s22 = scalar_lea.vmem %s985_s2, %s927_s19  ;;  %s309_s25 = scalar_lea.vmem %s984_s1, %s927_s19  ;;  %v785_v9 = vld [vmem:[%s300_s28] ss:$0 sm:$0xff]  ;;  %843 = vset.pattern.permute.xlu1 %v882_v14  ;;  %844 = vset.pattern.permute.xlu0 %v882_v14  ;;  %348 = vst.msk [vmem:[#allocation3] sm:$0xff] %vm345_vm1, %v883_v15  ;;  %349 = vst.msk [vmem:[#allocation3 + $0x8] sm:$0xff] %vm345_vm1, %v883_v15 }
   0xf   : > { %v355_v0 = vld [vmem:[%s319_s22] sm:$0xff]  ;;  %v356_v1 = vld [vmem:[%s319_s22 + $0x8] sm:$0xff]  ;;  %351 = vst.msk [vmem:[#allocation4] sm:$0xff] %vm350_vm0, %v883_v15  ;;  %352 = vst.msk [vmem:[#allocation4 + $0x8] sm:$0xff] %vm350_vm0, %v883_v15  ;;  %s329_s5 = scalar_lea.vmem %s986_s3, %s927_s19  ;;  %s339_s8 = scalar_lea.vmem %s987_s4, %s927_s19 }
  0x10   : > { %v353_v2 = vld [vmem:[%s309_s25] sm:$0xff]  ;;  %802 = vmatprep.subr.msk.mxu0 %vm350_vm0, %v356_v1  ;;  %v354_v3 = vld [vmem:[%s309_s25 + $0x8] sm:$0xff] }
  0x11   : > { %806 = vmatprep.mubr.msk.f32.mxu0 %vm350_vm0, %v353_v2  ;;  %803 = vmatpush3.xpose.msk.msra.mxu0 %vm350_vm0, %v356_v1  ;;  %v519_v24 = vld [vmem:[%s329_s5 + $0x8] sm:$0xff]  ;;  %v518_v25 = vld [vmem:[%s329_s5] sm:$0xff] }
  0x12   : > { %804 = vmatprep.subr.msk.mxu0 %vm350_vm0, %v355_v0  ;;  %809 = vmatprep.subr.mxu1 %v519_v24 }
  0x13   : > { %810 = vmatpush3.msra.mxu1 %v519_v24 }
  0x14   : > { %v456_v16 = vld [vmem:[#allocation2] sm:$0xff]  ;;  %v457_v19 = vld [vmem:[#allocation2 + $0x8] sm:$0xff]  ;;  %811 = vmatprep.subr.mxu1 %v518_v25 }
  0x15   : > { %805 = vmatpush3.xpose.msk.msra.mxu0 %vm350_vm0, %v355_v0  ;;  %812 = vmatpush3.msra.mxu1 %v518_v25  ;;  %v489_v40 = vld [vmem:[#allocation3] sm:$0xff]  ;;  %v490_v43 = vld [vmem:[#allocation3 + $0x8] sm:$0xff] }
  0x16   : > { %v505_v52 = vld [vmem:[#allocation4 + $0x8] sm:$0xff]  ;;  %v504_v54 = vld [vmem:[#allocation4] sm:$0xff] }
  0x18   : > { %807 = vmatmul.mubr.msk.f32.vlgmr.msra.gmra.mxu0 %vm350_vm0, %v354_v3 }
  0xd8   : > { %v808_v5 = vpop.f32.mrf.mxu0 }
  0xd9   : > { %v446_v7 = vmul.f32 0.125, %v808_v5 }
  0xda   : > { %v436_v6 = vpop.f32.mrf.mxu0 }
  0xdb   : > { %v445_v8 = vmul.f32 0.125, %v436_v6  ;;  %v455_v12 = vadd.f32 %v785_v9, %v446_v7 }
  0xdd   : > { %v454_v10 = vadd.f32 %v785_v9, %v445_v8  ;;  %v462_v13 = vsel %vm458_vm2, %v455_v12, -inf }
  0xdf   : > { %v459_v11 = vsel %vm458_vm2, %v454_v10, -inf }
  0xe0   : > { %460 = vmax.xlane.f32.xlu0 %v459_v11 }
  0xe4   : > { %463 = vmax.xlane.f32.xlu0 %v462_v13 }
 0x169   : > { %v461_v17 = vpop.xlane.xlu0 %460 }
 0x16a   : > { %v465_v18 = vmax.f32 %v456_v16, %v461_v17 }
 0x16c   : > { %v467_v20 = vsub.f32 %v456_v16, %v465_v18  ;;  %605 = vst.msk [vmem:[#allocation2] sm:$0xff] %vm345_vm1, %v465_v18  ;;  %475 = vperm.xlu1 %843, %v465_v18  }
 0x16d   : > { %v464_v21 = vpop.xlane.xlu0 %463 }
 0x16e   : > { %v466_v22 = vmax.f32 %v457_v19, %v464_v21  ;;  %v469_v37 = vmul.f32 1.442695, %v467_v20 }
 0x170   : > { %v468_v23 = vsub.f32 %v457_v19, %v466_v22  ;;  %606 = vst.msk [vmem:[#allocation2 + $0x8] sm:$0xff] %vm345_vm1, %v466_v22  ;;  %480 = vperm.xlu1 %843, %v466_v22  }
 0x172   : > { %v471_v35 = vmul.f32 1.442695, %v468_v23 }
 0x1e7   : > { %v476_v26 = vpop.permute.xlu1 %475 }
 0x1e8   : > { %v483_v27 = vsub.f32 %v454_v10, %v476_v26 }
 0x1ea   : > { %v485_v28 = vmul.f32 1.442695, %v483_v27 }
 0x1eb   : > { %v481_v29 = vpop.permute.xlu1 %480 }
 0x1ec   : > { %845 = vpow2.f32 %v485_v28  ;;  %v484_v30 = vsub.f32 %v455_v12, %v481_v29 }
 0x1ee   : > { %v487_v31 = vmul.f32 1.442695, %v484_v30 }
 0x1f0   : > { %847 = vpow2.f32 %v487_v31 }
 0x1f1   : > { %849 = vpow2.f32 %v471_v35 }
 0x1f2   : > { %851 = vpow2.f32 %v469_v37 }
 0x1f9   : > { %v846_v32 = vpop.eup %845 }
 0x1fa   : > { %813 = vmatprep.mubr.msk.f32.mxu1 %vm458_vm2, %v846_v32  ;;  %v493_v33 = vsel %vm458_vm2, %v846_v32, 0.0 }
 0x1fb   : > { %494 = vadd.xlane.f32.xlu0 %v493_v33 }
 0x1fd   : > { %v848_v34 = vpop.eup %847 }
 0x1fe   : > { %814 = vmatmul.mubr.msk.f32.vlgmr.msra.gmra.mxu1 %vm458_vm2, %v848_v34  ;;  %v496_v36 = vsel %vm458_vm2, %v848_v34, 0.0  ;;  %v850_v38 = vpop.eup %849 }
 0x1ff   : > { %497 = vadd.xlane.f32.xlu1 %v496_v36  ;;  %v852_v39 = vpop.eup %851  ;;  %v492_v45 = vmul.f32 %v850_v38, %v490_v43 }
 0x200   : > { %v491_v41 = vmul.f32 %v852_v39, %v489_v40 }
 0x210   : > { %513 = vperm.xlu1 %843, %v850_v38  }
 0x211   : > { %508 = vperm.xlu0 %844, %v852_v39  }
 0x284   : > { %v495_v42 = vpop.xlane.xlu0 %494 }
 0x285   : > { %v499_v44 = vadd.f32 %v495_v42, %v491_v41 }
 0x287   : > { %502 = vst.msk [vmem:[#allocation3] sm:$0xff] %vm345_vm1, %v499_v44 }
 0x288   : > { %v498_v46 = vpop.xlane.xlu1 %497 }
 0x289   : > { %v500_v47 = vadd.f32 %v498_v46, %v492_v45 }
 0x28b   : > { %503 = vst.msk [vmem:[#allocation3 + $0x8] sm:$0xff] %vm345_vm1, %v500_v47 }
 0x28c   : > { %v514_v53 = vpop.permute.xlu1 %513  ;;  %v509_v55 = vpop.permute.xlu0 %508 }
 0x28d   : > { %v517_v56 = vmul.f32 %v514_v53, %v505_v52  ;;  %v516_v58 = vmul.f32 %v509_v55, %v504_v54 }
 0x28e   : > { %v610_v48 = vld [vmem:[#allocation3] sm:$0xff] }
 0x28f   : > { %853 = vrcp.f32 %v610_v48 }
 0x292   : > { %v611_v49 = vld [vmem:[#allocation3 + $0x8] sm:$0xff] }
 0x293   : > { %855 = vrcp.f32 %v611_v49 }
 0x29c   : > { %v854_v50 = vpop.eup %853 }
 0x29d   : > { %618 = vperm.xlu0 %844, %v854_v50  }
 0x2a0   : > { %v856_v51 = vpop.eup %855 }
 0x2a1   : > { %623 = vperm.xlu0 %844, %v856_v51  }
 0x2be   : > { %v815_v57 = vpop.f32.mrf.mxu1 }
 0x2bf   : > { %v602_v59 = vadd.f32 %v815_v57, %v517_v56 }
 0x2c0   : > { %v592_v60 = vpop.f32.mrf.mxu1 }
 0x2c1   : > { %604 = vst.msk [vmem:[#allocation4 + $0x8] sm:$0xff] %vm350_vm0, %v602_v59  ;;  %v601_v61 = vadd.f32 %v592_v60, %v516_v58 }
 0x2c3   : > { %603 = vst.msk [vmem:[#allocation4] sm:$0xff] %vm350_vm0, %v601_v61 }
 0x2c8   : > { %v615_v1 = vld [vmem:[#allocation4 + $0x8] sm:$0xff] }
 0x2ca   : > { %v614_v62 = vld [vmem:[#allocation4] sm:$0xff] }
 0x318   : > { %v619_v63 = vpop.permute.xlu0 %618 }
 0x319   : > { %v626_v0 = vmul.f32 %v619_v63, %v614_v62 }
 0x31b   : > { %628 = vst.msk [vmem:[%s339_s8] sm:$0xff] %vm350_vm0, %v626_v0 }
 0x31c   : > { %v624_v2 = vpop.permute.xlu0 %623 }
 0x31d   : > { %v627_v3 = vmul.f32 %v624_v2, %v615_v1 }
 0x31f   : > { %629 = vst.msk [vmem:[%s339_s8 + $0x8] sm:$0xff] %vm350_vm0, %v627_v3 }
 0x320 PF: > { %s14_s17 = sadd.s32 1, %s879_s17   ;;  %s988_s15 = smov %s875_s16 }
 0x321   : > { %p11_p5 = scmp.ge.s32.totalorder %s14_s17, 6   ;;  %s989_s16 = smov %s991_s18 }
 0x323   :  { %13 = sbr.rel (!%p11_p5) target bundleno = 2 (0x2), region = 83 }

// kernel: _lambda_.7
= control target key start
LH: loop header
LB: loop body
LE: loop exit
PB: predicated region body
PF: predicated region fallthrough
CT: control target
= control target key end

     0   :  { %8 = vsyncpa [#allocation3], 0  ;;  %s686_s0 = inlined_call_operand.vmem [shape: f32[2,1,128], index: 0, kind: input, shape index: {}]   ;;  %s687_s1 = inlined_call_operand.vmem [shape: f32[2,16,128], index: 1, kind: input, shape index: {}]   ;;  %s688_s2 = inlined_call_operand.vmem [shape: f32[2,16,128], index: 2, kind: input, shape index: {}]   ;;  %s689_s3 = inlined_call_operand.hbm [shape: f32[2,16,128], index: 3, kind: output, shape index: {}]  }
   0x1   :  { %10 = vsyncpa [#allocation3 + $0x1], 0  ;;  %s566_s12 = smov 0   ;;  %s568_s13 = smov 0  }
   0x2   :  { %s570_s14 = smov 0   ;;  %s572_s15 = smov 0  }
   0x3   :  { %s574_s16 = smov 0   ;;  %s576_s17 = smov 0  }
   0x4 LB: > { %s389_s18 = sadd.s32 4294967295, %s541_s17   ;;  %s390_s19 = sadd.s32 4294967294, %s541_s17   ;;  %s541_s17 = sphi %s576_s17, %s16_s17   ;;  %s537_s16 = sphi %s574_s16, %s696_s16   ;;  %s533_s15 = sphi %s572_s15, %s695_s15   ;;  %s529_s14 = sphi %s570_s14, %s694_s14   ;;  %s525_s13 = sphi %s568_s13, %s693_s13   ;;  %s521_s12 = sphi %s566_s12, %s692_s12  }
   0x5   : > { %s28_s20 = sadd.s32 1, %s537_s16  ;;  %s119_s21 = sadd.s32 1, %s529_s14 }
   0x6   : > { %p30_p0 = scmp.ge.s32.totalorder %s28_s20, 2  ;;  %p129_p1 = scmp.ne.s32.totalorder %s529_s14, %s525_s13 }
   0x7   : > { %p130_p2 = scmp.eq.s32.totalorder %s389_s18, 1  ;;  %p135_p3 = scmp.ne.s32.totalorder %s525_s13, %s521_s12 }
   0x8   : > { %s698_s20 = smov (%p30_p0, %s28_s20), 0  ;;  %p136_p5 = scmp.eq.s32.totalorder %s390_s19, 1 }
   0x9   : > { %p606_p4 = por %p130_p2, %p129_p1  ;;  %s114_s23 = ssub.s32 %s537_s16, %s698_s20 }
   0xa   : > { %p393_p6 = scmp.ge.s32.totalorder %s541_s17, 1  ;;  %p117_p7 = scmp.eq.s32.totalorder %s114_s23, 0 }
   0xb   : > { %p613_p8 = por %p136_p5, %p135_p3  ;;  %p186_p9 = scmp.lt.s32.totalorder %s541_s17, 3 }
   0xc   : > { %s619_s25 = scalar_select %p117_p7, %s529_s14, %s119_s21  }
   0xd   : > { %p187_p10 = pnand %p393_p6, %p186_p9 }
   0xe   : > { %s223_s26 = sand.u32 (!%p187_p10), 1, %s525_s13   ;;  %p226_p11 = scmp.lt.s32.totalorder (!%p187_p10), %s533_s15, 1 }
   0xf   : > { %190 = sbr.rel (%p187_p10) target bundleno = 45 (0x2d), region = 32  ;;  %s394_s27 = sshll.u32 (!%p187_p10), %s223_s26, 4 }
  0x10   : > { %s225_s18 = scalar_lea.vmem (!%p187_p10), [#allocation2], %s394_s27  ;;  %s407_s21 = sshll.u32 (!%p187_p10), %s533_s15, 8 }
  0x11   : > { %s283_s19 = sshll.u32 (!%p187_p10), %s225_s18, 4  ;;  %s639_s29 = scalar_lea.hbm (!%p187_p10), %s689_s3, %s407_s21  ;;  %s634_s19 = int_to_ptr.vmem [resolvable:$true] %s283_s19 }
  0x12   : > { %s641_s27 = scalar_lea.sflag (!%p187_p10), [#allocation3], %s223_s26  ;;  %s543_s30 = smov (!%p187_p10), [#allocation2]  }
  0x14   : > { %s227_s28 = scalar_select %p226_p11, %s533_s15, 1 }
  0x15   : > { %s465_s15 = scalar_lea.vmem %s634_s19, 256 }
  0x16   : > { %s228_s4 = scalar_lea.vmem %s686_s0, %s227_s28  ;;  %s405_s5 = sshll.u32 %s227_s28, 4 }
  0x17   : > { %s237_s8 = scalar_lea.vmem %s687_s1, %s405_s5  ;;  %s247_s11 = scalar_lea.vmem %s688_s2, %s405_s5  ;;  %v399_v0 = vld [vmem:[%s228_s4] ss:$0 sm:$0xff] }
  0x18   : > { %v251_v1 = vld [vmem:[%s237_s8] sm:$0xff]  ;;  %v252_v4 = vld [vmem:[%s237_s8 + $0x8] sm:$0xff]  ;;  %p466_p12 = scmp.ne.s32.totalorder %s634_s19, %s465_s15  ;;  %s469_s4 = sshll.u32 %s543_s30, 4  ;;  %s470_s4 = int_to_ptr.vmem [resolvable:$false] %s469_s4 }
  0x19   : > { %v253_v2 = vld [vmem:[%s247_s11] sm:$0xff]  ;;  %v254_v5 = vld [vmem:[%s247_s11 + $0x8] sm:$0xff]  ;;  %s471_s5 = scalar_lea.vmem %s470_s4, 512  ;;  %p472_p1 = scmp.lt.s32.totalorder %s634_s19, %s470_s4 }
  0x1a   : > { %v261_v3 = vmul.f32 %v399_v0, %v253_v2  ;;  %v262_v6 = vmul.f32 %v399_v0, %v254_v5  ;;  %p467_p13 = pnand %p466_p12, %p606_p4  ;;  %p473_p2 = scmp.lt.s32.totalorder %s471_s5, %s465_s15 }
  0x1c   : > { %v263_v7 = vadd.f32 %v261_v3, %v251_v1  ;;  %v264_v8 = vadd.f32 %v262_v6, %v252_v4  ;;  %p468_p0 = pneg %p467_p13  ;;  %p474_p3 = por %p473_p2, %p472_p1 }
  0x1e   : > { %265 = vst [vmem:[%s225_s18] sm:$0xff] %v263_v7  ;;  %266 = vst [vmem:[%s225_s18 + $0x8] sm:$0xff] %v264_v8  ;;  %p475_p5 = pnand %p474_p3, %p468_p0 }
  0x20   : > { %478 = shalt.err (!%p475_p5)
}
  0x21   : > { %s479_s26 = scalar_lea.hbm %s639_s29, 256  ;;  %s483_s8 = scalar_lea.hbm %s689_s3, 512 }
  0x22   : > { %p480_p6 = scmp.ne.s32.totalorder %s639_s29, %s479_s26  ;;  %p484_p10 = scmp.lt.s32.totalorder %s639_s29, %s689_s3 }
  0x23   : > { %p485_p11 = scmp.lt.s32.totalorder %s483_s8, %s479_s26 }
  0x24   : > { %p481_p7 = pnand %p480_p6, %p606_p4 }
  0x25   : > { %p486_p12 = por %p485_p11, %p484_p10 }
  0x26   : > { %p482_p9 = pneg %p481_p7 }
  0x28   : > { %p487_p13 = pnand %p486_p12, %p482_p9 }
  0x2a   : > { %490 = shalt.err (!%p487_p13)
}
  0x2b   : > { %s544_s11 = smov 128   ;;  %s545_s18 = smov 8  }
  0x2c   : > { %408 = dma.vmem_to_hbm [thread:$0]  (%p606_p4), %s634_s19, 256, %s639_s29, %s641_s27, %s544_s11, %s544_s11, %s545_s18  }
  0x2d PF: > { %p414_p0 = scmp.ge.s32.totalorder %s541_s17, 2  ;;  %s298_s21 = sand.u32 1, %s521_s12  }
  0x2e   : > { %s299_s23 = scalar_lea.sflag [#allocation3], %s298_s21 }
  0x2f   : > { %p411_p1 = pnand %p414_p0, %p613_p8 }
  0x31   : > { %p412_p2 = pneg %p411_p1 }
  0x33   : > { %516 = dma.done.wait (%p412_p2), %s299_s23, 256  }
  0x34   : > { %518 = vsyncadd (%p412_p2), %s299_s23, 4294967040  ;;  %s16_s17 = sadd.s32 1, %s541_s17   ;;  %s692_s12 = smov %s525_s13 }
  0x35   : > { %p13_p3 = scmp.ge.s32.totalorder %s16_s17, 4   ;;  %s693_s13 = smov %s529_s14 }
  0x36   : > { %s694_s14 = smov %s619_s25  ;;  %s695_s15 = smov %s537_s16 }
  0x37   : > { %s696_s16 = smov %s698_s20  ;;  %15 = sbr.rel (!%p13_p3) target bundleno = 4 (0x4), region = 73 }
  0x3c   :  { %304 = vsyncpa [#allocation3], 1 }
  0x3d   :  { %306 = vsyncpa [#allocation3 + $0x1], 1 }

</bundles_post_ra>
